<compile_context>
chip_gen: v7x
topology: tpu7x:2x2x1
jax: 0.10.0
libtpu: 0.0.40
codegen_flags: <defaults>
</compile_context>

<pallas_src>
import jax
import jax.numpy as jnp
from jax.experimental import pallas as pl
from jax.experimental.pallas import tpu as pltpu


def _attention_kernel(x_ref, w_ref, b_ref, o_ref):
    # x_ref: (TB, T, D) VMEM | w_ref: (1, D) VMEM | b_ref: (1, 1) SMEM
    # o_ref: (TB, D) VMEM (lane-dense output slab)
    x = x_ref[...]                                        # (TB, T, D)
    w_row = w_ref[...].astype(jnp.float32)                # (1, D)
    bias = b_ref[0, 0]                                    # scalar read from SMEM

    # Linear(D -> 1): scores[b, t] = <x[b, t, :], w> + bias
    # VPU broadcast-multiply + lane reduce; avoids an N=1 MXU matmul and a
    # (D, 1) weight layout with 1/128 lane utilization.
    scores = jnp.sum(x.astype(jnp.float32) * w_row[:, None, :], axis=-1) + bias  # (TB, T)

    # Numerically-stable softmax over the time axis (f32 throughout).
    m = jnp.max(scores, axis=-1, keepdims=True)
    e = jnp.exp(scores - m)
    attn = e * pl.reciprocal(jnp.sum(e, axis=-1, keepdims=True), approx=False)   # (TB, T)

    # context[b, :] = attn[b, :] @ x[b, :, :]  — batched (1, T) @ (T, D) on the
    # MXU with f32 accumulation; result is a lane-dense (TB, D) slab.
    ctx = jnp.einsum(
        "bqt,btd->bqd",
        attn[:, None, :].astype(x.dtype),
        x,
        preferred_element_type=jnp.float32,
    )                                                     # (TB, 1, D)
    o_ref[...] = ctx[:, 0, :].astype(o_ref.dtype)


def _choose_batch_tile(B, T, D, itemsize, target_bytes=4 << 20):
    """Largest batch tile whose (TB, T, D) input slab stays under target_bytes.

    When TB < B it is kept a multiple of 8 so the (TB, D) output block stays
    sublane-aligned. If the whole batch fits in one slab but B is large, split
    into two grid steps so v7x's two TensorCores both get work; tiny (toy)
    batches collapse to a single block (grid of length 1).
    """
    row_bytes = max(1, T * D * itemsize)
    rows = max(1, target_bytes // row_bytes)
    if rows >= B:
        if B >= 16:
            half = -(-B // 2)              # ceil(B / 2)
            half = -(-half // 8) * 8       # round up to a multiple of 8
            if half < B:
                return half
        return B
    return min(B, max(8, (rows // 8) * 8))


def attention_forward(lstm_out, w, b):
    """lstm_out: (B, T, D), w: (1, D) [nn.Linear weight], b: (1, 1) -> (B, D)."""
    B, T, D = lstm_out.shape
    tb = _choose_batch_tile(B, T, D, lstm_out.dtype.itemsize)
    grid = (pl.cdiv(B, tb),)

    return pl.pallas_call(
        _attention_kernel,
        out_shape=jax.ShapeDtypeStruct((B, D), lstm_out.dtype),
        grid_spec=pltpu.PrefetchScalarGridSpec(
            num_scalar_prefetch=0,
            grid=grid,
            in_specs=[
                pl.BlockSpec((tb, T, D), lambda i: (i, 0, 0)),        # batch slab
                pl.BlockSpec((1, D), lambda i: (0, 0)),               # lane-dense weight row
                pl.BlockSpec(memory_space=pltpu.MemorySpace.SMEM),    # scalar bias in SMEM
            ],
            out_specs=pl.BlockSpec((tb, D), lambda i: (i, 0)),        # lane-dense output slab
        ),
        compiler_params=pltpu.CompilerParams(
            dimension_semantics=("parallel",),        # batch shards across TCs (v7x megacore)
            vmem_limit_bytes=32 * 1024 * 1024,        # safe on v5e/v6e/v7x; fits 2x4 MiB slabs
        ),
    )(lstm_out, w, b)


def reference_forward(lstm_out, w, b):
    scores = jnp.einsum("btd,od->bto", lstm_out, w) + b[0, 0]   # (B, T, 1)
    attn = jax.nn.softmax(scores, axis=1)
    return jnp.sum(attn * lstm_out, axis=1)                     # (B, D)


if __name__ == "__main__":
    key = jax.random.PRNGKey(0)
    hidden_dim = 16
    B, T, D = 2, 8, 2 * hidden_dim

    k_x, k_w, k_b = jax.random.split(key, 3)
    lstm_out = jax.random.normal(k_x, (B, T, D), dtype=jnp.float32)

    # nn.Linear(D, 1) parameters: weight (1, D), bias (1,), uniform(+-1/sqrt(D)).
    bound = 1.0 / jnp.sqrt(jnp.float32(D))
    w = jax.random.uniform(k_w, (1, D), jnp.float32, -bound, bound)
    b = jax.random.uniform(k_b, (1, 1), jnp.float32, -bound, bound)

    out = attention_forward(lstm_out, w, b)
    out = jax.block_until_ready(out)

    ref = reference_forward(lstm_out, w, b)
    assert out.shape == (B, D)
    assert jnp.allclose(out, ref, atol=1e-4, rtol=1e-4), "mismatch vs reference"

    print("KERNEL_OK")
</pallas_src>

<mosaic_0001>
module attributes {stable_mosaic.version = 11 : i64} {
  func.func @_attention_kernel(%arg0: i32, %arg1: memref<2x8x32xf32, #tpu.memory_space<vmem>>, %arg2: memref<1x32xf32, #tpu.memory_space<vmem>>, %arg3: memref<1x1xf32, #tpu.memory_space<smem>>, %arg4: memref<2x32xf32, #tpu.memory_space<vmem>>) attributes {dimension_semantics = [#tpu.dimension_semantics<parallel>], iteration_bounds = array<i64: 1>, scalar_prefetch = 0 : i64, scratch_operands = 0 : i64, tpu.core_type = #tpu.core_type<tc>, window_params = [{transform_indices = @transform_0, window_bounds = array<i64: 2, 8, 32>}, {pipeline_mode = #tpu.pipeline_mode<synchronous>, transform_indices = @transform_1, window_bounds = array<i64: 1, 32>}, {transform_indices = @transform_2, window_bounds = array<i64: 1, 1>}, {transform_indices = @transform_3, window_bounds = array<i64: 2, 32>}]} {
    %c0 = arith.constant 0 : index
    %c0_0 = arith.constant 0 : index
    %c0_1 = arith.constant 0 : index
    %0 = vector.load %arg1[%c0, %c0_0, %c0_1] : memref<2x8x32xf32, #tpu.memory_space<vmem>>, vector<2x8x32xf32>
    %c0_2 = arith.constant 0 : index
    %c0_3 = arith.constant 0 : index
    %1 = vector.load %arg2[%c0_2, %c0_3] : memref<1x32xf32, #tpu.memory_space<vmem>>, vector<1x32xf32>
    %c0_4 = arith.constant 0 : index
    %c0_5 = arith.constant 0 : index
    %2 = memref.load %arg3[%c0_4, %c0_5] : memref<1x1xf32, #tpu.memory_space<smem>>
    %3 = vector.shape_cast %1 : vector<1x32xf32> to vector<1x1x32xf32>
    %4 = vector.broadcast %3 : vector<1x1x32xf32> to vector<2x8x32xf32>
    %5 = arith.mulf %0, %4 : vector<2x8x32xf32>
    %cst = arith.constant dense<0.000000e+00> : vector<2x8xf32>
    %6 = vector.multi_reduction <add>, %5, %cst [2] : vector<2x8x32xf32> to vector<2x8xf32>
    %7 = vector.broadcast %2 : f32 to vector<2x8xf32>
    %8 = arith.addf %6, %7 : vector<2x8xf32>
    %cst_6 = arith.constant dense<0xFF800000> : vector<2xf32>
    %9 = vector.multi_reduction <maximumf>, %8, %cst_6 [1] : vector<2x8xf32> to vector<2xf32>
    %10 = vector.shape_cast %9 : vector<2xf32> to vector<2x1xf32>
    %11 = vector.broadcast %10 : vector<2x1xf32> to vector<2x8xf32>
    %12 = arith.subf %8, %11 : vector<2x8xf32>
    %13 = math.exp %12 : vector<2x8xf32>
    %cst_7 = arith.constant dense<0.000000e+00> : vector<2xf32>
    %14 = vector.multi_reduction <add>, %13, %cst_7 [1] : vector<2x8xf32> to vector<2xf32>
    %15 = vector.shape_cast %14 : vector<2xf32> to vector<2x1xf32>
    %16 = tpu.reciprocal %15 : vector<2x1xf32> -> vector<2x1xf32>
    %17 = vector.broadcast %16 : vector<2x1xf32> to vector<2x8xf32>
    %18 = arith.mulf %13, %17 : vector<2x8xf32>
    %19 = vector.shape_cast %18 : vector<2x8xf32> to vector<2x1x8xf32>
    "tpu.trace_start"() <{level = 10 : i32, message = "bqt,btd->bqd"}> : () -> ()
    %cst_8 = arith.constant dense<0.000000e+00> : vector<2x1x32xf32>
    %20 = tpu.matmul %19, %0, %cst_8 {dimension_numbers = #tpu.dot_dimension_numbers<[2], [1], [1], [2], [0, 0, 0, 1, 1, 2], [0], [0]>} : vector<2x1x8xf32>, vector<2x8x32xf32>, vector<2x1x32xf32> -> vector<2x1x32xf32>
    "tpu.trace_stop"() : () -> ()
    %21 = vector.shape_cast %20 : vector<2x1x32xf32> to vector<2x32xf32>
    %c0_9 = arith.constant 0 : index
    %c0_10 = arith.constant 0 : index
    %22 = vector.load %arg4[%c0_9, %c0_10] : memref<2x32xf32, #tpu.memory_space<vmem>>, vector<2x32xf32>
    tpu.vector_store %arg4[%c0_9, %c0_10], %21 {strides = array<i32>} : memref<2x32xf32, #tpu.memory_space<vmem>>, vector<2x32xf32>,
    return
  }
  func.func @transform_0(%arg0: i32) -> (i32, i32, i32) {
    %c0_i32 = arith.constant 0 : i32
    %c0_i32_0 = arith.constant 0 : i32
    %c0_i32_1 = arith.constant 0 : i32
    return %arg0, %c0_i32, %c0_i32_0 : i32, i32, i32
  }
  func.func @transform_1(%arg0: i32) -> (i32, i32) {
    %c0_i32 = arith.constant 0 : i32
    %c0_i32_0 = arith.constant 0 : i32
    %c0_i32_1 = arith.constant 0 : i32
    return %c0_i32, %c0_i32_0 : i32, i32
  }
  func.func @transform_2(%arg0: i32) -> (i32, i32) {
    %c0_i32 = arith.constant 0 : i32
    %c0_i32_0 = arith.constant 0 : i32
    %c0_i32_1 = arith.constant 0 : i32
    return %c0_i32, %c0_i32_0 : i32, i32
  }
  func.func @transform_3(%arg0: i32) -> (i32, i32) {
    %c0_i32 = arith.constant 0 : i32
    %c0_i32_0 = arith.constant 0 : i32
    return %arg0, %c0_i32 : i32, i32
  }
}

</mosaic_0001>

<bundles_post_ra>
// kernel: tpu_custom_call.1
= control target key start
LH: loop header
LB: loop body
LE: loop exit
PB: predicated region body
PF: predicated region fallthrough
CT: control target
= control target key end

     0   :  { %9 = vsyncpa [#allocation4], 0  ;;  %s452_s0 = inlined_call_operand.hbm [shape: f32[2,8,32], index: 0, kind: input, shape index: {}]   ;;  %s453_s1 = inlined_call_operand.vmem [shape: f32[1,32], index: 1, kind: input, shape index: {}]   ;;  %s454_s2 = inlined_call_operand.<no memory space> [shape: f32[1,1], index: 2, kind: input, shape index: {}]   ;;  %s455_s3 = inlined_call_operand.hbm [shape: f32[2,32], index: 3, kind: output, shape index: {}]  }
   0x1   :  { %10 = vsyncpa [#allocation5], 0  ;;  %s386_s12 = smov [#allocation3]   ;;  %s338_s16 = scalar_lea.hbm %s452_s0, 256 }
   0x2   :  { %s16_s13 = sshll.u32 %s386_s12, 4  ;;  %p339_p0 = scmp.ne.s32.totalorder %s452_s0, %s338_s16  ;;  %s17_s13 = int_to_ptr.vmem [resolvable:$true] %s16_s13 }
   0x3   :  { %p342_p1 = scmp.lt.u32.totalorder %s338_s16, %s452_s0 }
   0x5   :  { %p344_p2 = pnand %p342_p1, %p339_p0 }
   0x7   :  { %347 = shalt.err (!%p344_p2)
}
   0x8   :  { %s348_s21 = scalar_lea.vmem %s17_s13, 256  ;;  %p353_p4 = scmp.lt.s32.totalorder %s17_s13, %s17_s13 }
   0x9   :  { %p349_p3 = scmp.ne.s32.totalorder %s17_s13, %s348_s21  ;;  %p354_p5 = scmp.lt.s32.totalorder %s348_s21, %s348_s21 }
   0xb   :  { %p355_p6 = por %p354_p5, %p353_p4 }
   0xd   :  { %p356_p7 = pnand %p355_p6, %p349_p3 }
   0xf   :  { %359 = shalt.err (!%p356_p7)
}
  0x10   :  { %s387_s22 = smov 128   ;;  %s388_s23 = smov 8  }
  0x11   :  { %22 = dma.hbm_to_vmem [thread:$0]  %s452_s0, 256, %s17_s13, [#allocation4], %s387_s22, %s387_s22, %s388_s23  }
  0x12   :  { %382 = dma.done.wait [#allocation4], 256  }
  0x13   :  { %383 = vsyncadd [#allocation4], 4294967040  ;;  %v425_v0 = vld [vmem:[#allocation3] sm:$0xff]  ;;  %vm42_vm0 = vcmask 261120   ;;  %v31_v2 = vld [vmem:[#allocation3 + $0x8] sm:$0xff]  ;;  %v54_v7 = vlaneseq  ;;  %v49_v10 = vstv %s454_s2  ;;  %vm64_vm1 = vcmask 1041409  }
  0x14   :  { %v306_v1 = vld [vmem:[%s453_s1] ss:$0 sm:$0xff]  ;;  %vm67_vm2 = vcmask 58368   ;;  %v389_v20 = vmov 0   ;;  %v390_v43 = vmov 0.0   ;;  %vm391_vm3 = vmmov 0  }
  0x15   :  { %v40_v3 = vmul.f32 %v306_v1, %v425_v0  ;;  %v41_v4 = vmul.f32 %v306_v1, %v31_v2  ;;  %v55_v8 = vand.u32 127, %v54_v7  ;;  %v57_v9 = vshrl.u32 %v54_v7, 7  ;;  %331 = vset.pattern.permute.xlu0 %v389_v20  ;;  %330 = vset.pattern.permute.xlu1 %v389_v20  ;;  %s392_s1 = smov [#allocation6]  }
  0x16   :  { %318 = vmatprep.subr.mxu1 %v390_v43  ;;  %320 = vmatprep.mubr.msk.f32.mxu1 %vm391_vm3, %v390_v43  ;;  %vm131_vm4 = vcmask 64512   ;;  %s297_s2 = sshll.u32 %s392_s1, 4  ;;  %vm289_vm5 = vcmask 254976   ;;  %s298_s2 = int_to_ptr.vmem [resolvable:$true] %s297_s2 }
  0x17   :  { %v43_v5 = vsel %vm42_vm0, %v40_v3, 0.0  ;;  %v46_v6 = vsel %vm42_vm0, %v41_v4, 0.0  ;;  %v58_v12 = vsub.s32 %v55_v8, %v57_v9  ;;  %v74_v21 = vsub.s32 0, %v57_v9  ;;  %319 = vmatpush3.msra.mxu1 %v31_v2  ;;  %313 = vmatprep.subr.mxu0 %v390_v43  ;;  %s360_s29 = scalar_lea.vmem %s298_s2, 32  ;;  %p365_p9 = scmp.lt.s32.totalorder %s298_s2, %s298_s2 }
  0x18   :  { %44 = vadd.xlane.f32.xlu0 %v43_v5  ;;  %v78_v22 = vsub.s32 1, %v57_v9  ;;  %315 = vmatprep.mubr.msk.f32.mxu0 %vm391_vm3, %v390_v43  ;;  %p361_p8 = scmp.ne.s32.totalorder %s298_s2, %s360_s29  ;;  %p366_p10 = scmp.lt.s32.totalorder %s360_s29, %s360_s29 }
  0x19   :  { %314 = vmatpush3.msra.mxu0 %v425_v0 }
  0x1a   :  { %p367_p11 = por %p366_p10, %p365_p9 }
  0x1c   :  { %47 = vadd.xlane.f32.xlu0 %v46_v6  ;;  %p368_p12 = pnand %p367_p11, %p361_p8 }
  0xa5   :  { %v45_v11 = vpop.xlane.xlu0 %44 }
  0xa6   :  { %v50_v13 = vadd.f32 %v49_v10, %v45_v11 }
  0xa8   :  { %v59_v16 = vrot.slane %v50_v13, %v58_v12 }
  0xa9   :  { %v48_v14 = vpop.xlane.xlu0 %47 }
  0xaa   :  { %v51_v15 = vadd.f32 %v49_v10, %v48_v14 }
  0xac   :  { %v63_v17 = vrot.slane %v51_v15, %v58_v12 }
  0xae   :  { %v65_v18 = vsel %vm64_vm1, %v63_v17, %v59_v16 }
  0xaf   :  { %v68_v19 = vsel %vm67_vm2, %v65_v18, -inf }
  0xb0   :  { %69 = vmax.xlane.f32.xlu1 %v68_v19 }
 0x13d   :  { %v70_v23 = vpop.xlane.xlu1 %69 }
 0x13e   :  { %v75_v24 = vrot.slane %v70_v23, %v74_v21  ;;  %v79_v25 = vrot.slane %v70_v23, %v78_v22 }
 0x140   :  { %v82_v26 = vsub.f32 %v50_v13, %v75_v24  ;;  %v83_v27 = vsub.f32 %v51_v15, %v79_v25 }
 0x142   :  { %v84_v28 = vmul.f32 1.442695, %v82_v26  ;;  %v86_v29 = vmul.f32 1.442695, %v83_v27 }
 0x144   :  { %332 = vpow2.f32 %v84_v28 }
 0x145   :  { %334 = vpow2.f32 %v86_v29 }
 0x14e   :  { %v333_v30 = vpop.eup %332 }
 0x14f   :  { %v335_v31 = vpop.eup %334  ;;  %91 = vperm.xlu1 %330, %v333_v30  }
 0x150   :  { %94 = vperm.xlu0 %331, %v335_v31  }
 0x1ce   :  { %v92_v32 = vpop.permute.xlu1 %91 }
 0x1cf   :  { %v95_v33 = vpop.permute.xlu0 %94  ;;  %v99_v34 = vrot.slane %v92_v32, %v58_v12 }
 0x1d0   :  { %v103_v35 = vrot.slane %v95_v33, %v58_v12 }
 0x1d2   :  { %v104_v36 = vsel %vm64_vm1, %v103_v35, %v99_v34 }
 0x1d3   :  { %v106_v37 = vsel %vm67_vm2, %v104_v36, 0.0 }
 0x1d4   :  { %107 = vadd.xlane.f32.xlu1 %v106_v37 }
 0x261   :  { %v108_v38 = vpop.xlane.xlu1 %107 }
 0x262   :  { %336 = vrcp.f32 %v108_v38 }
 0x26c   :  { %v337_v39 = vpop.eup %336 }
 0x26d   :  { %v118_v40 = vrot.slane %v337_v39, %v78_v22  ;;  %v114_v42 = vrot.slane %v337_v39, %v74_v21 }
 0x26f   :  { %v122_v41 = vmul.f32 %v335_v31, %v118_v40  ;;  %v121_v44 = vmul.f32 %v333_v30, %v114_v42 }
 0x271   :  { %206 = vperm.xlu0 %331, %v122_v41  }
 0x275   :  { %125 = vperm.xlu0 %331, %v121_v44  }
 0x2f0   :  { %v207_v45 = vpop.permute.xlu0 %206 }
 0x2f1   :  { %v211_v46 = vrot.slane %v207_v45, %v58_v12 }
 0x2f3   :  { %321 = vmatmul.mubr.msk.f32.vlgmr.msra.gmra.mrb[0].mxu1 %vm131_vm4, %v211_v46 }
 0x2f4   :  { %v126_v47 = vpop.permute.xlu0 %125 }
 0x2f5   :  { %v130_v48 = vrot.slane %v126_v47, %v58_v12 }
 0x2f7   :  { %316 = vmatmul.mubr.msk.f32.vlgmr.msra.gmra.mrb[0].mxu0 %vm131_vm4, %v130_v48 }
 0x3c6   :  { %v280_v49 = vpop.f32.mrb[0].mxu1 }
 0x3c7   :  { %v322_v50 = vpop.f32.mrb[1].mxu1  ;;  %v286_v51 = vrot.slane %v280_v49, 7 }
 0x3ca   :  { %v200_v52 = vpop.f32.mrb[0].mxu0 }
 0x3cb   :  { %v287_v53 = vsel %vm64_vm1, %v286_v51, %v200_v52  ;;  %v317_v54 = vpop.f32.mrb[1].mxu0 }
 0x3cc   :  { %290 = vst.msk [vmem:[#allocation6] sm:$0x3] %vm289_vm5, %v287_v53 }
 0x3cd   :  { %371 = shalt.err (!%p368_p12)
}
 0x3ce   :  { %s372_s5 = scalar_lea.hbm %s455_s3, 32 }
 0x3cf   :  { %p373_p13 = scmp.ne.s32.totalorder %s455_s3, %s372_s5  ;;  %p376_p0 = scmp.lt.u32.totalorder %s372_s5, %s455_s3 }
 0x3d1   :  { %p378_p1 = pnand %p376_p0, %p373_p13 }
 0x3d3   :  { %381 = shalt.err (!%p378_p1)
}
 0x3d4   :  { %300 = dma.vmem_to_hbm [thread:$0]  %s298_s2, 32, %s455_s3, [#allocation5]  }
 0x3d5   :  { %384 = dma.done.wait [#allocation5], 32  }
 0x3d6   :  { %385 = vsyncadd [#allocation5], 4294967264 }
 0x3d7   :  { %304 = vsyncpa [#allocation4], 1 }
 0x3d8   :  { %305 = vsyncpa [#allocation5], 1 }

</bundles_post_ra>
